<compile_context>
chip_gen: v6e
topology: v6e:2x2x1
jax: 0.10.0
libtpu: 0.0.40
codegen_flags: <defaults>
</compile_context>

<pallas_src>
import functools

import jax
import jax.numpy as jnp
from jax.experimental import pallas as pl
from jax.experimental.pallas import tpu as pltpu


# ----------------------------- kernel: y = relu(x * g + b) --------------------------

def cond_kernel(x_ref, g_ref, b_ref, o_ref, *, tr):
    # x_ref: (TR, TL)          rows = flattened (n, c), lanes = tile of flattened (h, w)
    # g_ref: (rows_padded, 1)  grid-invariant, resident in VMEM across all steps
    # b_ref: (rows_padded, 1)
    i = pl.program_id(0)
    r0 = pl.multiple_of(i * tr, tr)           # aligned dynamic row offset into g/b
    g = g_ref[pl.ds(r0, tr), :]               # (TR, 1) per-row gamma
    b = b_ref[pl.ds(r0, tr), :]               # (TR, 1) per-row beta
    z = x_ref[...] * g + b                    # FiLM modulation (lane-broadcast on VPU)
    o_ref[...] = jnp.maximum(z, 0)            # fused ReLU; dtype already matches out


# ----------------------------- tiling heuristics -------------------------------------

_TILE_BYTES = 3 << 20      # per x/out tile; pipeline holds ~4x => ~12 MiB < 16 MiB (v5e)
_LANE_TILE = 16384         # lane-tile cap (multiple of 128)
_MIN_SPLIT_BYTES = 1 << 20 # only force a >=2-step grid when the problem is big enough


def _tile_params(rows, lanes, itemsize):
    packing = max(1, 4 // itemsize)           # rows packed per sublane (bf16=2, int8=4)
    sub = 8 * packing                         # row-tile granularity
    tl = lanes if lanes <= _LANE_TILE else _LANE_TILE

    tr = max(sub, (_TILE_BYTES // (tl * itemsize)) // sub * sub)
    if tr >= rows:
        tr = rows                             # full-dim block is always legal

    grid_r, grid_l = pl.cdiv(rows, tr), pl.cdiv(lanes, tl)

    # Keep >= 2 grid steps when possible so v7x's two TensorCores both get work.
    if (grid_r * grid_l == 1 and rows >= 2 * sub
            and rows * lanes * itemsize >= _MIN_SPLIT_BYTES):
        tr = ((rows // 2 + sub - 1) // sub) * sub
        grid_r = pl.cdiv(rows, tr)

    return tr, tl, grid_r, grid_l


# ----------------------------- wrapper ----------------------------------------------

def _cond_layer_2d(x2, g2, b2):
    rows, lanes = x2.shape
    itemsize = jnp.dtype(x2.dtype).itemsize
    tr, tl, grid_r, grid_l = _tile_params(rows, lanes, itemsize)

    # Pad g/b to grid_r * tr rows so the grid-invariant block plus in-kernel pl.ds
    # slicing never reads out of bounds (padding is tiny: N*C scalars).
    rows_p = grid_r * tr
    if rows_p != rows:
        g2 = jnp.pad(g2, ((0, rows_p - rows), (0, 0)))
        b2 = jnp.pad(b2, ((0, rows_p - rows), (0, 0)))

    kernel = functools.partial(cond_kernel, tr=tr)
    return pl.pallas_call(
        kernel,
        out_shape=jax.ShapeDtypeStruct((rows, lanes), x2.dtype),
        grid_spec=pltpu.PrefetchScalarGridSpec(
            num_scalar_prefetch=0,
            grid=(grid_r, grid_l),
            in_specs=[
                pl.BlockSpec((tr, tl), lambda i, j: (i, j)),        # x tile
                pl.BlockSpec((rows_p, 1), lambda i, j: (0, 0)),     # gammas (resident)
                pl.BlockSpec((rows_p, 1), lambda i, j: (0, 0)),     # betas  (resident)
            ],
            out_specs=pl.BlockSpec((tr, tl), lambda i, j: (i, j)),
        ),
        compiler_params=pltpu.CompilerParams(
            # Independent output tiles along both axes (v7x shards across its 2 TCs).
            dimension_semantics=("parallel", "parallel"),
        ),
    )(x2, g2, b2)


@jax.jit
def cond_layer_forward(x, gammas, betas):
    """relu(x * gammas.expand_as(x) + betas.expand_as(x)) for NCHW x.

    gammas/betas must be numpy-broadcastable to (N, C, 1, 1) — the usual FiLM
    per-sample, per-channel conditioning, e.g. (N, C, 1, 1) or (1, C, 1, 1).
    (A bare (C,) vector is NOT broadcastable to that shape; reshape it first.)
    """
    n, c, h, w = x.shape
    rows, lanes = n * c, h * w
    # Layout plumbing only (contiguous reshapes / broadcasts, no gathers):
    x2 = x.reshape(rows, lanes)                                              # lane-dense
    g2 = jnp.broadcast_to(gammas, (n, c, 1, 1)).reshape(rows, 1).astype(x.dtype)
    b2 = jnp.broadcast_to(betas, (n, c, 1, 1)).reshape(rows, 1).astype(x.dtype)
    out2 = _cond_layer_2d(x2, g2, b2)
    return out2.reshape(n, c, h, w)


# ----------------------------- pure-JAX reference ------------------------------------

def reference_forward(x, gammas, betas):
    z = x * jnp.broadcast_to(gammas, x.shape) + jnp.broadcast_to(betas, x.shape)
    return jnp.maximum(z, 0.0)


# ----------------------------- main ---------------------------------------------------

if __name__ == "__main__":
    N, C, H, W = 2, 4, 16, 16

    key = jax.random.PRNGKey(0)
    kx, kg, kb = jax.random.split(key, 3)
    x = jax.random.normal(kx, (N, C, H, W), jnp.float32)
    gammas = jax.random.normal(kg, (N, C, 1, 1), jnp.float32)   # FiLM conditioning
    betas = jax.random.normal(kb, (N, C, 1, 1), jnp.float32)

    out = cond_layer_forward(x, gammas, betas)
    out = jax.block_until_ready(out)
    assert out.shape == (N, C, H, W), out.shape

    ref = reference_forward(x, gammas, betas)
    err = float(jnp.max(jnp.abs(out - ref)))
    assert err < 1e-6, f"max abs error vs reference: {err}"

    print("KERNEL_OK")
</pallas_src>

<mosaic_0001>
module attributes {stable_mosaic.version = 11 : i64} {
  func.func @cond_kernel(%arg0: i32, %arg1: i32, %arg2: memref<8x256xf32, #tpu.memory_space<vmem>>, %arg3: memref<8x1xf32, #tpu.memory_space<vmem>>, %arg4: memref<8x1xf32, #tpu.memory_space<vmem>>, %arg5: memref<8x256xf32, #tpu.memory_space<vmem>>) attributes {dimension_semantics = [#tpu.dimension_semantics<parallel>, #tpu.dimension_semantics<parallel>], iteration_bounds = array<i64: 1, 1>, scalar_prefetch = 0 : i64, scratch_operands = 0 : i64, tpu.core_type = #tpu.core_type<tc>, window_params = [{transform_indices = @transform_0, window_bounds = array<i64: 8, 256>}, {pipeline_mode = #tpu.pipeline_mode<synchronous>, transform_indices = @transform_1, window_bounds = array<i64: 8, 1>}, {pipeline_mode = #tpu.pipeline_mode<synchronous>, transform_indices = @transform_2, window_bounds = array<i64: 8, 1>}, {transform_indices = @transform_3, window_bounds = array<i64: 8, 256>}]} {
    %c8_i32 = arith.constant 8 : i32
    %0 = arith.muli %arg0, %c8_i32 : i32
    %1 = tpu.assume_multiple %0, 8 : i32
    %2 = arith.index_cast %1 : i32 to index
    %c0 = arith.constant 0 : index
    %3 = vector.load %arg3[%2, %c0] : memref<8x1xf32, #tpu.memory_space<vmem>>, vector<8x1xf32>
    %4 = arith.index_cast %1 : i32 to index
    %c0_0 = arith.constant 0 : index
    %5 = vector.load %arg4[%4, %c0_0] : memref<8x1xf32, #tpu.memory_space<vmem>>, vector<8x1xf32>
    %c0_1 = arith.constant 0 : index
    %c0_2 = arith.constant 0 : index
    %6 = vector.load %arg2[%c0_1, %c0_2] : memref<8x256xf32, #tpu.memory_space<vmem>>, vector<8x256xf32>
    %7 = vector.broadcast %3 : vector<8x1xf32> to vector<8x256xf32>
    %8 = arith.mulf %6, %7 : vector<8x256xf32>
    %9 = vector.broadcast %5 : vector<8x1xf32> to vector<8x256xf32>
    %10 = arith.addf %8, %9 : vector<8x256xf32>
    %cst = arith.constant 0.000000e+00 : f32
    %11 = vector.broadcast %cst : f32 to vector<8x256xf32>
    %12 = arith.maximumf %10, %11 : vector<8x256xf32>
    %c0_3 = arith.constant 0 : index
    %c0_4 = arith.constant 0 : index
    %13 = vector.load %arg5[%c0_3, %c0_4] : memref<8x256xf32, #tpu.memory_space<vmem>>, vector<8x256xf32>
    tpu.vector_store %arg5[%c0_3, %c0_4], %12 {strides = array<i32>} : memref<8x256xf32, #tpu.memory_space<vmem>>, vector<8x256xf32>,
    return
  }
  func.func @transform_0(%arg0: i32, %arg1: i32) -> (i32, i32) {
    %c0_i32 = arith.constant 0 : i32
    return %arg0, %arg1 : i32, i32
  }
  func.func @transform_1(%arg0: i32, %arg1: i32) -> (i32, i32) {
    %c0_i32 = arith.constant 0 : i32
    %c0_i32_0 = arith.constant 0 : i32
    %c0_i32_1 = arith.constant 0 : i32
    return %c0_i32, %c0_i32_0 : i32, i32
  }
  func.func @transform_2(%arg0: i32, %arg1: i32) -> (i32, i32) {
    %c0_i32 = arith.constant 0 : i32
    %c0_i32_0 = arith.constant 0 : i32
    %c0_i32_1 = arith.constant 0 : i32
    return %c0_i32, %c0_i32_0 : i32, i32
  }
  func.func @transform_3(%arg0: i32, %arg1: i32) -> (i32, i32) {
    %c0_i32 = arith.constant 0 : i32
    return %arg0, %arg1 : i32, i32
  }
}

</mosaic_0001>

<bundles_post_ra>
// kernel: cond_layer_forward.1
= control target key start
LH: loop header
LB: loop body
LE: loop exit
PB: predicated region body
PF: predicated region fallthrough
CT: control target
= control target key end

     0   :  { %v45_v0 = vmov 0   ;;  %s84_s1 = inlined_call_operand.vmem [shape: f32[8,1], index: 1, kind: input, shape index: {}]   ;;  %s85_s2 = inlined_call_operand.vmem [shape: f32[8,1], index: 2, kind: input, shape index: {}]   ;;  %s86_s0 = inlined_call_operand.vmem [shape: f32[8,256], index: 0, kind: input, shape index: {}]   ;;  %s87_s3 = inlined_call_operand.vmem [shape: f32[8,256], index: 3, kind: output, shape index: {}]  }
   0x1   :  { %44 = vset.pattern.permute.xlu0 %v45_v0  ;;  %v16_v1 = vld [vmem:[%s84_s1] sm:$0xff]  ;;  %v20_v5 = vld [vmem:[%s86_s0 + $0x8] sm:$0xff] }
   0x2   :  { %23 = vperm.xlu0 %44, %v16_v1   ;;  %v18_v2 = vld [vmem:[%s85_s2] sm:$0xff] }
   0x3   :  { %v19_v4 = vld [vmem:[%s86_s0] sm:$0xff] }
   0x6   :  { %30 = vperm.xlu0 %44, %v18_v2  }
  0x7d   :  { %v24_v3 = vpop.permute.xlu0 %23 }
  0x7e   :  { %v26_v6 = vmul.f32 %v24_v3, %v19_v4  ;;  %v27_v7 = vmul.f32 %v24_v3, %v20_v5 }
  0x81   :  { %v31_v8 = vpop.permute.xlu0 %30 }
  0x82   :  { %v33_v9 = vadd.f32 %v31_v8, %v26_v6  ;;  %v34_v10 = vadd.f32 %v31_v8, %v27_v7 }
  0x84   :  { %v35_v11 = vmax.f32 %v33_v9, 0.0  ;;  %v36_v12 = vmax.f32 %v34_v10, 0.0 }
  0x86   :  { %37 = vst [vmem:[%s87_s3] sm:$0xff] %v35_v11  ;;  %38 = vst [vmem:[%s87_s3 + $0x8] sm:$0xff] %v36_v12 }

</bundles_post_ra>
